<compile_context>
chip_gen: v6e
topology: v6e:2x2x1
jax: 0.10.0
libtpu: 0.0.40
codegen_flags: <defaults>
</compile_context>

<pallas_src>
import jax
import jax.numpy as jnp
from jax import lax
from jax.experimental import pallas as pl
from jax.experimental.pallas import tpu as pltpu

INPUT_SIZE = 63
HIDDEN_SIZE = 128
NUM_CLASSES = 8      # stands in for len(GESTURE_LIST)
IN_PAD = 64          # 63 -> 64 : aligned K dim (padded w1 rows are zero -> exact)


def mlp_kernel(x_ref, w1_ref, b1_ref, w2_ref, b2_ref, w3t_ref, b3t_ref, ot_ref):
    # One (tb, IN_PAD) batch tile.  Hidden activations never leave vregs/VMEM.
    # Matmul inputs bf16, accumulation f32; bias+ReLU epilogues in f32.
    h1 = jnp.dot(x_ref[...], w1_ref[...], preferred_element_type=jnp.float32)
    h1 = jnp.maximum(h1 + b1_ref[...], 0.0)
    h2 = jnp.dot(h1.astype(jnp.bfloat16), w2_ref[...],
                 preferred_element_type=jnp.float32)
    h2 = jnp.maximum(h2 + b2_ref[...], 0.0)
    # Transposed last layer: (8,128) x (tb,128) contracted on the lane dim
    # -> (8, tb); output block is lane-dense along batch, no padded columns.
    out_t = lax.dot_general(w3t_ref[...], h2.astype(jnp.bfloat16),
                            dimension_numbers=(((1,), (1,)), ((), ())),
                            preferred_element_type=jnp.float32)
    ot_ref[...] = out_t + b3t_ref[...]


def _choose_tb(batch, max_tb=1024):
    # Largest tile (multiple of 128) that still gives >= 2 grid steps,
    # so v7x's two TensorCores both get work via dimension_semantics.
    for cand in (2048, 1024, 512, 256, 128):
        if cand <= max_tb and -(-batch // cand) >= 2:
            return cand
    return 128  # tiny batch: one tile


def prepare_params(params):
    """One-time padding / transpose / bf16 cast of the weights (hoisted out of forward)."""
    w1, b1, w2, b2, w3, b3 = params
    w1_p = (jnp.zeros((IN_PAD, HIDDEN_SIZE), jnp.float32)
            .at[:INPUT_SIZE, :].set(w1).astype(jnp.bfloat16))      # (64, 128) bf16
    b1_p = b1.reshape(1, HIDDEN_SIZE).astype(jnp.float32)
    w2_p = w2.astype(jnp.bfloat16)                                 # (128, 128) bf16
    b2_p = b2.reshape(1, HIDDEN_SIZE).astype(jnp.float32)
    w3t = jnp.transpose(w3).astype(jnp.bfloat16)                   # (8, 128) bf16
    b3t = b3.reshape(NUM_CLASSES, 1).astype(jnp.float32)           # (8, 1) f32
    return (w1_p, b1_p, w2_p, b2_p, w3t, b3t)


def gesture_classifier_forward(x, prepared, *, max_tb=1024):
    """x: [batch, INPUT_SIZE] f32.  prepared: output of prepare_params()."""
    w1_p, b1_p, w2_p, b2_p, w3t, b3t = prepared
    batch = x.shape[0]
    tb = _choose_tb(batch, max_tb)
    padded_batch = ((batch + tb - 1) // tb) * tb
    n_tiles = padded_batch // tb

    # Single fused pad (batch rows + one zero feature column) + bf16 cast.
    x_p = jnp.pad(x, ((0, padded_batch - batch),
                      (0, IN_PAD - INPUT_SIZE))).astype(jnp.bfloat16)

    def resident(shape):
        # Constant index_map -> DMA'd once, stays pinned in VMEM across the grid.
        # (Default double-buffering accepted; total resident footprint ~0.1 MiB.)
        return pl.BlockSpec(shape, lambda i: (0, 0))

    flops = 2 * padded_batch * (IN_PAD * HIDDEN_SIZE
                                + HIDDEN_SIZE * HIDDEN_SIZE
                                + HIDDEN_SIZE * NUM_CLASSES)
    bytes_accessed = (2 * (x_p.size + w1_p.size + w2_p.size + w3t.size)
                      + 4 * (b1_p.size + b2_p.size + b3t.size)
                      + 4 * NUM_CLASSES * padded_batch)

    out_t = pl.pallas_call(
        mlp_kernel,
        out_shape=jax.ShapeDtypeStruct((NUM_CLASSES, padded_batch), jnp.float32),
        grid_spec=pltpu.PrefetchScalarGridSpec(
            num_scalar_prefetch=0,
            grid=(n_tiles,),
            in_specs=[
                pl.BlockSpec((tb, IN_PAD), lambda i: (i, 0)),   # streamed x tile
                resident((IN_PAD, HIDDEN_SIZE)),
                resident((1, HIDDEN_SIZE)),
                resident((HIDDEN_SIZE, HIDDEN_SIZE)),
                resident((1, HIDDEN_SIZE)),
                resident((NUM_CLASSES, HIDDEN_SIZE)),
                resident((NUM_CLASSES, 1)),
            ],
            out_specs=pl.BlockSpec((NUM_CLASSES, tb), lambda i: (0, i)),
        ),
        compiler_params=pltpu.CompilerParams(
            dimension_semantics=("parallel",),
        ),
        cost_estimate=pl.CostEstimate(
            flops=flops, transcendentals=0, bytes_accessed=bytes_accessed),
    )(x_p, w1_p, b1_p, w2_p, b2_p, w3t, b3t)

    # (8, padded_batch) -> (batch, 8): tiny slice + transpose in the wrapper.
    return out_t[:, :batch].T


def init_params(key):
    k1, k2, k3, k4, k5, k6 = jax.random.split(key, 6)

    def unif(k, shape, fan_in):
        bound = 1.0 / jnp.sqrt(fan_in)
        return jax.random.uniform(k, shape, jnp.float32, -bound, bound)

    w1 = unif(k1, (INPUT_SIZE, HIDDEN_SIZE), INPUT_SIZE)
    b1 = unif(k2, (1, HIDDEN_SIZE), INPUT_SIZE)
    w2 = unif(k3, (HIDDEN_SIZE, HIDDEN_SIZE), HIDDEN_SIZE)
    b2 = unif(k4, (1, HIDDEN_SIZE), HIDDEN_SIZE)
    w3 = unif(k5, (HIDDEN_SIZE, NUM_CLASSES), HIDDEN_SIZE)
    b3 = unif(k6, (1, NUM_CLASSES), HIDDEN_SIZE)
    return (w1, b1, w2, b2, w3, b3)


if __name__ == "__main__":
    key = jax.random.PRNGKey(0)
    kx, kp = jax.random.split(key)

    # batch=1000 -> tb=512 (two grid steps, padded to 1024): exercises the
    # larger-tile path, batch padding, and megacore-parallel grid.
    batch = 1000
    x = jax.random.normal(kx, (batch, INPUT_SIZE), jnp.float32)
    params = init_params(kp)
    prepared = prepare_params(params)

    fwd = jax.jit(gesture_classifier_forward)
    out = fwd(x, prepared)
    jax.block_until_ready(out)

    # Reference in plain JAX (eval-mode dropout = identity), f32 unpadded math.
    w1, b1, w2, b2, w3, b3 = params
    h = jnp.maximum(x @ w1 + b1, 0.0)
    h = jnp.maximum(h @ w2 + b2, 0.0)
    ref = h @ w3 + b3

    assert out.shape == (batch, NUM_CLASSES)
    # Tolerance loosened for bf16 matmul inputs (f32 accumulation).
    assert jnp.allclose(out, ref, atol=2e-2, rtol=2e-2)

    print("KERNEL_OK")
</pallas_src>

<mosaic_0001>
module attributes {stable_mosaic.version = 11 : i64} {
  func.func @mlp_kernel(%arg0: i32, %arg1: memref<512x64xbf16, #tpu.memory_space<vmem>>, %arg2: memref<64x128xbf16, #tpu.memory_space<vmem>>, %arg3: memref<1x128xf32, #tpu.memory_space<vmem>>, %arg4: memref<128x128xbf16, #tpu.memory_space<vmem>>, %arg5: memref<1x128xf32, #tpu.memory_space<vmem>>, %arg6: memref<8x128xbf16, #tpu.memory_space<vmem>>, %arg7: memref<8x1xf32, #tpu.memory_space<vmem>>, %arg8: memref<8x512xf32, #tpu.memory_space<vmem>>) attributes {dimension_semantics = [#tpu.dimension_semantics<parallel>], iteration_bounds = array<i64: 2>, scalar_prefetch = 0 : i64, scratch_operands = 0 : i64, tpu.core_type = #tpu.core_type<tc>, window_params = [{transform_indices = @transform_0, window_bounds = array<i64: 512, 64>}, {pipeline_mode = #tpu.pipeline_mode<synchronous>, transform_indices = @transform_1, window_bounds = array<i64: 64, 128>}, {pipeline_mode = #tpu.pipeline_mode<synchronous>, transform_indices = @transform_2, window_bounds = array<i64: 1, 128>}, {pipeline_mode = #tpu.pipeline_mode<synchronous>, transform_indices = @transform_3, window_bounds = array<i64: 128, 128>}, {pipeline_mode = #tpu.pipeline_mode<synchronous>, transform_indices = @transform_4, window_bounds = array<i64: 1, 128>}, {pipeline_mode = #tpu.pipeline_mode<synchronous>, transform_indices = @transform_5, window_bounds = array<i64: 8, 128>}, {pipeline_mode = #tpu.pipeline_mode<synchronous>, transform_indices = @transform_6, window_bounds = array<i64: 8, 1>}, {transform_indices = @transform_7, window_bounds = array<i64: 8, 512>}]} {
    %c0 = arith.constant 0 : index
    %c0_0 = arith.constant 0 : index
    %0 = vector.load %arg1[%c0, %c0_0] : memref<512x64xbf16, #tpu.memory_space<vmem>>, vector<512x64xbf16>
    %c0_1 = arith.constant 0 : index
    %c0_2 = arith.constant 0 : index
    %1 = vector.load %arg2[%c0_1, %c0_2] : memref<64x128xbf16, #tpu.memory_space<vmem>>, vector<64x128xbf16>
    %cst = arith.constant dense<0.000000e+00> : vector<512x128xf32>
    %2 = tpu.matmul %0, %1, %cst {dimension_numbers = #tpu.dot_dimension_numbers<[1], [0], [0], [1], [0, 0, 1, 1], [], []>} : vector<512x64xbf16>, vector<64x128xbf16>, vector<512x128xf32> -> vector<512x128xf32>
    %c0_3 = arith.constant 0 : index
    %c0_4 = arith.constant 0 : index
    %3 = vector.load %arg3[%c0_3, %c0_4] : memref<1x128xf32, #tpu.memory_space<vmem>>, vector<1x128xf32>
    %4 = vector.broadcast %3 : vector<1x128xf32> to vector<512x128xf32>
    %5 = arith.addf %2, %4 : vector<512x128xf32>
    %cst_5 = arith.constant 0.000000e+00 : f32
    %6 = vector.broadcast %cst_5 : f32 to vector<512x128xf32>
    %7 = arith.maximumf %5, %6 : vector<512x128xf32>
    %8 = arith.truncf %7 : vector<512x128xf32> to vector<512x128xbf16>
    %c0_6 = arith.constant 0 : index
    %c0_7 = arith.constant 0 : index
    %9 = vector.load %arg4[%c0_6, %c0_7] : memref<128x128xbf16, #tpu.memory_space<vmem>>, vector<128x128xbf16>
    %cst_8 = arith.constant dense<0.000000e+00> : vector<512x128xf32>
    %10 = tpu.matmul %8, %9, %cst_8 {dimension_numbers = #tpu.dot_dimension_numbers<[1], [0], [0], [1], [0, 0, 1, 1], [], []>} : vector<512x128xbf16>, vector<128x128xbf16>, vector<512x128xf32> -> vector<512x128xf32>
    %c0_9 = arith.constant 0 : index
    %c0_10 = arith.constant 0 : index
    %11 = vector.load %arg5[%c0_9, %c0_10] : memref<1x128xf32, #tpu.memory_space<vmem>>, vector<1x128xf32>
    %12 = vector.broadcast %11 : vector<1x128xf32> to vector<512x128xf32>
    %13 = arith.addf %10, %12 : vector<512x128xf32>
    %cst_11 = arith.constant 0.000000e+00 : f32
    %14 = vector.broadcast %cst_11 : f32 to vector<512x128xf32>
    %15 = arith.maximumf %13, %14 : vector<512x128xf32>
    %c0_12 = arith.constant 0 : index
    %c0_13 = arith.constant 0 : index
    %16 = vector.load %arg6[%c0_12, %c0_13] : memref<8x128xbf16, #tpu.memory_space<vmem>>, vector<8x128xbf16>
    %17 = arith.truncf %15 : vector<512x128xf32> to vector<512x128xbf16>
    %cst_14 = arith.constant dense<0.000000e+00> : vector<8x512xf32>
    %18 = tpu.matmul %16, %17, %cst_14 {dimension_numbers = #tpu.dot_dimension_numbers<[1], [1], [0], [0], [0, 0, 1, 0], [], []>} : vector<8x128xbf16>, vector<512x128xbf16>, vector<8x512xf32> -> vector<8x512xf32>
    %c0_15 = arith.constant 0 : index
    %c0_16 = arith.constant 0 : index
    %19 = vector.load %arg7[%c0_15, %c0_16] : memref<8x1xf32, #tpu.memory_space<vmem>>, vector<8x1xf32>
    %20 = vector.broadcast %19 : vector<8x1xf32> to vector<8x512xf32>
    %21 = arith.addf %18, %20 : vector<8x512xf32>
    %c0_17 = arith.constant 0 : index
    %c0_18 = arith.constant 0 : index
    %22 = vector.load %arg8[%c0_17, %c0_18] : memref<8x512xf32, #tpu.memory_space<vmem>>, vector<8x512xf32>
    tpu.vector_store %arg8[%c0_17, %c0_18], %21 {strides = array<i32>} : memref<8x512xf32, #tpu.memory_space<vmem>>, vector<8x512xf32>,
    return
  }
  func.func @transform_0(%arg0: i32) -> (i32, i32) {
    %c0_i32 = arith.constant 0 : i32
    %c0_i32_0 = arith.constant 0 : i32
    return %arg0, %c0_i32 : i32, i32
  }
  func.func @transform_1(%arg0: i32) -> (i32, i32) {
    %c0_i32 = arith.constant 0 : i32
    %c0_i32_0 = arith.constant 0 : i32
    %c0_i32_1 = arith.constant 0 : i32
    return %c0_i32, %c0_i32_0 : i32, i32
  }
  func.func @transform_2(%arg0: i32) -> (i32, i32) {
    %c0_i32 = arith.constant 0 : i32
    %c0_i32_0 = arith.constant 0 : i32
    %c0_i32_1 = arith.constant 0 : i32
    return %c0_i32, %c0_i32_0 : i32, i32
  }
  func.func @transform_3(%arg0: i32) -> (i32, i32) {
    %c0_i32 = arith.constant 0 : i32
    %c0_i32_0 = arith.constant 0 : i32
    %c0_i32_1 = arith.constant 0 : i32
    return %c0_i32, %c0_i32_0 : i32, i32
  }
  func.func @transform_4(%arg0: i32) -> (i32, i32) {
    %c0_i32 = arith.constant 0 : i32
    %c0_i32_0 = arith.constant 0 : i32
    %c0_i32_1 = arith.constant 0 : i32
    return %c0_i32, %c0_i32_0 : i32, i32
  }
  func.func @transform_5(%arg0: i32) -> (i32, i32) {
    %c0_i32 = arith.constant 0 : i32
    %c0_i32_0 = arith.constant 0 : i32
    %c0_i32_1 = arith.constant 0 : i32
    return %c0_i32, %c0_i32_0 : i32, i32
  }
  func.func @transform_6(%arg0: i32) -> (i32, i32) {
    %c0_i32 = arith.constant 0 : i32
    %c0_i32_0 = arith.constant 0 : i32
    %c0_i32_1 = arith.constant 0 : i32
    return %c0_i32, %c0_i32_0 : i32, i32
  }
  func.func @transform_7(%arg0: i32) -> (i32, i32) {
    %c0_i32 = arith.constant 0 : i32
    %c0_i32_0 = arith.constant 0 : i32
    return %c0_i32, %arg0 : i32, i32
  }
}

</mosaic_0001>

<bundles_post_ra>
// kernel: gesture_classifier_forward.1
= control target key start
LH: loop header
LB: loop body
LE: loop exit
PB: predicated region body
PF: predicated region fallthrough
CT: control target
= control target key end

     0   :  { %s2089_s24 = smov 0   ;;  %s2449_s0 = inlined_call_operand.vmem [shape: bf16[1024,64], index: 0, kind: input, shape index: {}]   ;;  %s2450_s1 = inlined_call_operand.vmem [shape: bf16[64,128], index: 1, kind: input, shape index: {}]   ;;  %s2451_s2 = inlined_call_operand.vmem [shape: f32[1,128], index: 2, kind: input, shape index: {}]   ;;  %s2452_s3 = inlined_call_operand.vmem [shape: bf16[128,128], index: 3, kind: input, shape index: {}]   ;;  %s2453_s4 = inlined_call_operand.vmem [shape: f32[1,128], index: 4, kind: input, shape index: {}]   ;;  %s2454_s5 = inlined_call_operand.vmem [shape: bf16[8,128], index: 5, kind: input, shape index: {}]   ;;  %s2455_s6 = inlined_call_operand.vmem [shape: f32[8,1], index: 6, kind: input, shape index: {}]   ;;  %s2456_s7 = inlined_call_operand.vmem [shape: f32[8,1024], index: 7, kind: output, shape index: {}]  }
   0x1 LB: > { %s1633_s25 = sadd.s32 4294967295, %s2046_s24   ;;  %p1637_p0 = scmp.ge.s32.totalorder %s2046_s24, 1  ;;  %s2046_s24 = sphi %s2089_s24, %s17_s24  }
   0x2   : > { %p238_p1 = scmp.lt.s32.totalorder %s2046_s24, 3 }
   0x4   : > { %p239_p2 = pnand %p1637_p0, %p238_p1 }
   0x5   : > { %s1638_s28 = sshll.u32 (!%p239_p2), %s1633_s25, 6  ;;  %s1640_s19 = sshll.u32 (!%p239_p2), %s1633_s25, 2 }
   0x6   : > { %242 = sbr.rel (%p239_p2) target bundleno = 820 (0x334), region = 48  ;;  %p271_p3 = scmp.lt.s32.totalorder (!%p239_p2), %s1638_s28, 127 }
   0x7   : > { %p277_p4 = scmp.lt.s32.totalorder (!%p239_p2), %s1640_s19, 7 }
   0xb   : > { %v1996_v0 = vld [vmem:[%s2450_s1 + $0x18] sm:$0xff]   ;;  %v1997_v1 = vld [vmem:[%s2450_s1 + $0x10] sm:$0xff]   ;;  %v1998_v2 = vld [vmem:[%s2450_s1 + $0x8] sm:$0xff]   ;;  %s2458_s28 = smov (!%p271_p3, %s1638_s28), 127  ;;  %vm546_vm0 = vcmask 523264   ;;  %s2460_s19 = smov (!%p277_p4, %s1640_s19), 7 }
   0xc   : > { %1834 = vmatprep.subr.bf16.mxu0 %v1996_v0  ;;  %s1639_s10 = sshll.u32 %s2458_s28, 2  ;;  %v1999_v4 = vld [vmem:[%s2450_s1] sm:$0xff]   ;;  %v2032_v13 = vld [vmem:[%s2452_s3 + $0x38] sm:$0xff]   ;;  %v2033_v14 = vld [vmem:[%s2452_s3 + $0x30] sm:$0xff]   ;;  %s1641_s20 = sshll.u32 %s2460_s19, 3 }
   0xd   : > { %1835 = vmatpush3.bf16.msra.mxu0 %v1996_v0  ;;  %s2111_s13 = scalar_lea.vmem %s2449_s0, %s1639_s10  ;;  %1906 = vmatprep.subr.bf16.mxu1 %v2032_v13  ;;  %v2034_v15 = vld [vmem:[%s2452_s3 + $0x28] sm:$0xff]   ;;  %v2035_v18 = vld [vmem:[%s2452_s3 + $0x20] sm:$0xff]   ;;  %v2036_v19 = vld [vmem:[%s2452_s3 + $0x18] sm:$0xff]   ;;  %s280_s23 = scalar_lea.vmem %s2456_s7, %s1641_s20 }
   0xe   : > { %1836 = vmatprep.subr.bf16.mxu0 %v1997_v1  ;;  %v2000_v3 = vld [vmem:[%s2111_s13] sm:$0xff]   ;;  %v2001_v5 = vld [vmem:[%s2111_s13 + $0x8] sm:$0xff]   ;;  %v2002_v6 = vld [vmem:[%s2111_s13 + $0x10] sm:$0xff]   ;;  %1907 = vmatpush3.bf16.msra.mxu1 %v2032_v13 }
   0xf   : > { %1842 = vmatprep.mubr.msk.bf16.mxu0 %vm546_vm0, %v2000_v3  ;;  %v2003_v7 = vld [vmem:[%s2111_s13 + $0x18] sm:$0xff]   ;;  %v2004_v8 = vld [vmem:[%s2111_s13 + $0x20] sm:$0xff]   ;;  %v2005_v9 = vld [vmem:[%s2111_s13 + $0x28] sm:$0xff]   ;;  %1908 = vmatprep.subr.bf16.mxu1 %v2033_v14 }
  0x10   : > { %v2006_v10 = vld [vmem:[%s2111_s13 + $0x30] sm:$0xff]   ;;  %v2007_v11 = vld [vmem:[%s2111_s13 + $0x38] sm:$0xff]   ;;  %v2008_v12 = vld [vmem:[%s2111_s13 + $0x40] sm:$0xff]  }
  0x11   : > { %1837 = vmatpush3.bf16.msra.mxu0 %v1997_v1  ;;  %v2009_v16 = vld [vmem:[%s2111_s13 + $0x48] sm:$0xff]   ;;  %v2010_v17 = vld [vmem:[%s2111_s13 + $0x50] sm:$0xff]   ;;  %v2011_v20 = vld [vmem:[%s2111_s13 + $0x58] sm:$0xff]  }
  0x12   : > { %1838 = vmatprep.subr.bf16.mxu0 %v1998_v2  ;;  %1909 = vmatpush3.bf16.msra.mxu1 %v2033_v14  ;;  %v2012_v21 = vld [vmem:[%s2111_s13 + $0x60] sm:$0xff]   ;;  %v2013_v22 = vld [vmem:[%s2111_s13 + $0x68] sm:$0xff]   ;;  %v2014_v23 = vld [vmem:[%s2111_s13 + $0x70] sm:$0xff]  }
  0x13   : > { %1910 = vmatprep.subr.bf16.mxu1 %v2034_v15  ;;  %v2015_v24 = vld [vmem:[%s2111_s13 + $0x78] sm:$0xff]   ;;  %v2016_v25 = vld [vmem:[%s2111_s13 + $0x80] sm:$0xff]   ;;  %v2017_v26 = vld [vmem:[%s2111_s13 + $0x88] sm:$0xff]  }
  0x14   : > { %v2018_v27 = vld [vmem:[%s2111_s13 + $0x90] sm:$0xff]   ;;  %v2019_v29 = vld [vmem:[%s2111_s13 + $0x98] sm:$0xff]   ;;  %v2038_v30 = vld [vmem:[%s2452_s3 + $0x8] sm:$0xff]  }
  0x15   : > { %1839 = vmatpush3.bf16.msra.mxu0 %v1998_v2  ;;  %v2037_v28 = vld [vmem:[%s2452_s3 + $0x10] sm:$0xff]   ;;  %v2020_v31 = vld [vmem:[%s2111_s13 + $0xa0] sm:$0xff]   ;;  %v2021_v33 = vld [vmem:[%s2111_s13 + $0xa8] sm:$0xff]  }
  0x16   : > { %1840 = vmatprep.subr.bf16.mxu0 %v1999_v4  ;;  %1911 = vmatpush3.bf16.msra.mxu1 %v2034_v15  ;;  %v2039_v32 = vld [vmem:[%s2452_s3] sm:$0xff]   ;;  %v2022_v34 = vld [vmem:[%s2111_s13 + $0xb0] sm:$0xff]   ;;  %v2023_v35 = vld [vmem:[%s2111_s13 + $0xb8] sm:$0xff]  }
  0x17   : > { %1912 = vmatprep.subr.bf16.mxu1 %v2035_v18  ;;  %v2024_v36 = vld [vmem:[%s2111_s13 + $0xc0] sm:$0xff]   ;;  %v2025_v37 = vld [vmem:[%s2111_s13 + $0xc8] sm:$0xff]   ;;  %v2026_v38 = vld [vmem:[%s2111_s13 + $0xd0] sm:$0xff]  }
  0x18   : > { %v2027_v39 = vld [vmem:[%s2111_s13 + $0xd8] sm:$0xff]   ;;  %v2028_v40 = vld [vmem:[%s2111_s13 + $0xe0] sm:$0xff]   ;;  %v2029_v41 = vld [vmem:[%s2111_s13 + $0xe8] sm:$0xff]  }
  0x19   : > { %1841 = vmatpush3.bf16.msra.mxu0 %v1999_v4  ;;  %v2030_v42 = vld [vmem:[%s2111_s13 + $0xf0] sm:$0xff]   ;;  %v2031_v43 = vld [vmem:[%s2111_s13 + $0xf8] sm:$0xff]   ;;  %v2207_v46 = vld [vmem:[%s2451_s2] ss:$0 sm:$0xff] }
  0x1a   : > { %1913 = vmatpush3.bf16.msra.mxu1 %v2035_v18 }
  0x1b   : > { %1914 = vmatprep.subr.bf16.mxu1 %v2036_v19 }
  0x1c   : > { %1843 = vmatmul.mubr.msk.bf16.vlgmr.msra.gmra.mxu0 %vm546_vm0, %v2001_v5 }
  0x1d   : > { %1846 = vmatprep.mubr.msk.bf16.mxu0 %vm546_vm0, %v2002_v6 }
  0x1e   : > { %1915 = vmatpush3.bf16.msra.mxu1 %v2036_v19 }
  0x1f   : > { %1916 = vmatprep.subr.bf16.mxu1 %v2037_v28 }
  0x22   : > { %1917 = vmatpush3.bf16.msra.mxu1 %v2037_v28 }
  0x23   : > { %1918 = vmatprep.subr.bf16.mxu1 %v2038_v30 }
  0x24   : > { %1847 = vmatmul.mubr.msk.bf16.gmra.mxu0 %vm546_vm0, %v2003_v7 }
  0x25   : > { %1850 = vmatprep.mubr.msk.bf16.mxu0 %vm546_vm0, %v2004_v8 }
  0x26   : > { %1919 = vmatpush3.bf16.msra.mxu1 %v2038_v30 }
  0x27   : > { %1920 = vmatprep.subr.bf16.mxu1 %v2039_v32 }
  0x2a   : > { %1921 = vmatpush3.bf16.msra.mxu1 %v2039_v32 }
  0x2c   : > { %1851 = vmatmul.mubr.msk.bf16.gmra.mxu0 %vm546_vm0, %v2005_v9 }
  0x2d   : > { %1854 = vmatprep.mubr.msk.bf16.mxu0 %vm546_vm0, %v2006_v10 }
  0x34   : > { %1855 = vmatmul.mubr.msk.bf16.gmra.mxu0 %vm546_vm0, %v2007_v11 }
  0x35   : > { %1858 = vmatprep.mubr.msk.bf16.mxu0 %vm546_vm0, %v2008_v12 }
  0x3c   : > { %1859 = vmatmul.mubr.msk.bf16.gmra.mxu0 %vm546_vm0, %v2009_v16 }
  0x3d   : > { %1862 = vmatprep.mubr.msk.bf16.mxu0 %vm546_vm0, %v2010_v17 }
  0x44   : > { %1863 = vmatmul.mubr.msk.bf16.gmra.mxu0 %vm546_vm0, %v2011_v20 }
  0x45   : > { %1866 = vmatprep.mubr.msk.bf16.mxu0 %vm546_vm0, %v2012_v21 }
  0x4c   : > { %1867 = vmatmul.mubr.msk.bf16.gmra.mxu0 %vm546_vm0, %v2013_v22 }
  0x4d   : > { %1870 = vmatprep.mubr.msk.bf16.mxu0 %vm546_vm0, %v2014_v23 }
  0x54   : > { %1871 = vmatmul.mubr.msk.bf16.gmra.mxu0 %vm546_vm0, %v2015_v24 }
  0x55   : > { %1874 = vmatprep.mubr.msk.bf16.mxu0 %vm546_vm0, %v2016_v25 }
  0x5c   : > { %1875 = vmatmul.mubr.msk.bf16.gmra.mxu0 %vm546_vm0, %v2017_v26 }
  0x5d   : > { %1878 = vmatprep.mubr.msk.bf16.mxu0 %vm546_vm0, %v2018_v27 }
  0x64   : > { %1879 = vmatmul.mubr.msk.bf16.gmra.mxu0 %vm546_vm0, %v2019_v29 }
  0x65   : > { %1882 = vmatprep.mubr.msk.bf16.mxu0 %vm546_vm0, %v2020_v31 }
  0x6c   : > { %1883 = vmatmul.mubr.msk.bf16.gmra.mxu0 %vm546_vm0, %v2021_v33 }
  0x6d   : > { %1886 = vmatprep.mubr.msk.bf16.mxu0 %vm546_vm0, %v2022_v34 }
  0x74   : > { %1887 = vmatmul.mubr.msk.bf16.gmra.mxu0 %vm546_vm0, %v2023_v35 }
  0x75   : > { %1890 = vmatprep.mubr.msk.bf16.mxu0 %vm546_vm0, %v2024_v36 }
  0x7c   : > { %1891 = vmatmul.mubr.msk.bf16.gmra.mxu0 %vm546_vm0, %v2025_v37 }
  0x7d   : > { %1894 = vmatprep.mubr.msk.bf16.mxu0 %vm546_vm0, %v2026_v38 }
  0x84   : > { %1895 = vmatmul.mubr.msk.bf16.gmra.mxu0 %vm546_vm0, %v2027_v39 }
  0x85   : > { %1898 = vmatprep.mubr.msk.bf16.mxu0 %vm546_vm0, %v2028_v40 }
  0x8c   : > { %1899 = vmatmul.mubr.msk.bf16.gmra.mxu0 %vm546_vm0, %v2029_v41 }
  0x8d   : > { %1902 = vmatprep.mubr.msk.bf16.mxu0 %vm546_vm0, %v2030_v42 }
  0x94   : > { %1903 = vmatmul.mubr.msk.bf16.gmra.mxu0 %vm546_vm0, %v2031_v43 }
  0xdc   : > { %v1844_v44 = vpop.f32.mrf.mxu0 }
  0xdd   : > { %v686_v50 = vadd.f32 %v1844_v44, %v2207_v46 }
  0xde   : > { %v677_v45 = vpop.f32.mrf.mxu0 }
  0xdf   : > { %v678_v48 = vadd.f32 %v2207_v46, %v677_v45  ;;  %v934_v57 = vmax.f32 %v686_v50, 0.0 }
  0xe0   : > { %v1845_v47 = vpop.f32.mrf.mxu0 }
  0xe1   : > { %v689_v49 = vadd.f32 %v1845_v47, %v2207_v46  ;;  %v932_v55 = vmax.f32 %v678_v48, 0.0 }
  0xe2   : > { %v680_v51 = vpop.f32.mrf.mxu0 }
  0xe3   : > { %v681_v52 = vadd.f32 %v2207_v46, %v680_v51  ;;  %v935_v53 = vmax.f32 %v689_v49, 0.0 }
  0xe4   : > { %v1848_v54 = vpop.f32.mrf.mxu0 }
  0xe5   : > { %v933_v56 = vmax.f32 %v681_v52, 0.0  ;;  %v997_v60 = vpack.c.bf16 %v935_v53, %v934_v57  ;;  %v702_v0 = vadd.f32 %v1848_v54, %v2207_v46 }
  0xe6   : > { %v693_v58 = vpop.f32.mrf.mxu0 }
  0xe7   : > { %v996_v59 = vpack.c.bf16 %v933_v56, %v932_v55  ;;  %v694_v62 = vadd.f32 %v2207_v46, %v693_v58  ;;  %v938_v7 = vmax.f32 %v702_v0, 0.0 }
  0xe8   : > { %v1849_v61 = vpop.f32.mrf.mxu0 }
  0xe9   : > { %v705_v63 = vadd.f32 %v1849_v61, %v2207_v46  ;;  %1922 = vmatprep.mubr.bf16.mxu1 %v996_v59  ;;  %v936_v5 = vmax.f32 %v694_v62, 0.0 }
  0xea   : > { %v696_v1 = vpop.f32.mrf.mxu0  ;;  %1923 = vmatmul.mubr.bf16.vlgmr.msra.gmra.mxu1 %v997_v60 }
  0xeb   : > { %v697_v2 = vadd.f32 %v2207_v46, %v696_v1  ;;  %v939_v3 = vmax.f32 %v705_v63, 0.0 }
  0xec   : > { %v1852_v4 = vpop.f32.mrf.mxu0 }
  0xed   : > { %v937_v6 = vmax.f32 %v697_v2, 0.0  ;;  %v999_v10 = vpack.c.bf16 %v939_v3, %v938_v7  ;;  %v718_v14 = vadd.f32 %v1852_v4, %v2207_v46 }
  0xee   : > { %v709_v8 = vpop.f32.mrf.mxu0 }
  0xef   : > { %v998_v9 = vpack.c.bf16 %v937_v6, %v936_v5  ;;  %v710_v12 = vadd.f32 %v2207_v46, %v709_v8  ;;  %v942_v21 = vmax.f32 %v718_v14, 0.0 }
  0xf0   : > { %v1853_v11 = vpop.f32.mrf.mxu0 }
  0xf1   : > { %v721_v13 = vadd.f32 %v1853_v11, %v2207_v46  ;;  %1926 = vmatprep.mubr.bf16.mxu1 %v998_v9  ;;  %v940_v19 = vmax.f32 %v710_v12, 0.0 }
  0xf2   : > { %v712_v15 = vpop.f32.mrf.mxu0  ;;  %1927 = vmatmul.mubr.bf16.gmra.mxu1 %v999_v10 }
  0xf3   : > { %v713_v16 = vadd.f32 %v2207_v46, %v712_v15  ;;  %v943_v17 = vmax.f32 %v721_v13, 0.0 }
  0xf4   : > { %v1856_v18 = vpop.f32.mrf.mxu0 }
  0xf5   : > { %v941_v20 = vmax.f32 %v713_v16, 0.0  ;;  %v1001_v24 = vpack.c.bf16 %v943_v17, %v942_v21  ;;  %v734_v28 = vadd.f32 %v1856_v18, %v2207_v46 }
  0xf6   : > { %v725_v22 = vpop.f32.mrf.mxu0 }
  0xf7   : > { %v1000_v23 = vpack.c.bf16 %v941_v20, %v940_v19  ;;  %v726_v26 = vadd.f32 %v2207_v46, %v725_v22  ;;  %v946_v35 = vmax.f32 %v734_v28, 0.0 }
  0xf8   : > { %v1857_v25 = vpop.f32.mrf.mxu0 }
  0xf9   : > { %v737_v27 = vadd.f32 %v1857_v25, %v2207_v46  ;;  %1930 = vmatprep.mubr.bf16.mxu1 %v1000_v23  ;;  %v944_v33 = vmax.f32 %v726_v26, 0.0 }
  0xfa   : > { %v728_v29 = vpop.f32.mrf.mxu0  ;;  %1931 = vmatmul.mubr.bf16.gmra.mxu1 %v1001_v24 }
  0xfb   : > { %v729_v30 = vadd.f32 %v2207_v46, %v728_v29  ;;  %v947_v31 = vmax.f32 %v737_v27, 0.0 }
  0xfc   : > { %v1860_v32 = vpop.f32.mrf.mxu0 }
  0xfd   : > { %v945_v34 = vmax.f32 %v729_v30, 0.0  ;;  %v1003_v38 = vpack.c.bf16 %v947_v31, %v946_v35  ;;  %v750_v42 = vadd.f32 %v1860_v32, %v2207_v46 }
  0xfe   : > { %v741_v36 = vpop.f32.mrf.mxu0 }
  0xff   : > { %v1002_v37 = vpack.c.bf16 %v945_v34, %v944_v33  ;;  %v742_v40 = vadd.f32 %v2207_v46, %v741_v36  ;;  %v950_v50 = vmax.f32 %v750_v42, 0.0 }
 0x100   : > { %v1861_v39 = vpop.f32.mrf.mxu0 }
 0x101   : > { %v753_v41 = vadd.f32 %v1861_v39, %v2207_v46  ;;  %1934 = vmatprep.mubr.bf16.mxu1 %v1002_v37  ;;  %v948_v48 = vmax.f32 %v742_v40, 0.0 }
 0x102   : > { %v744_v43 = vpop.f32.mrf.mxu0  ;;  %1935 = vmatmul.mubr.bf16.gmra.mxu1 %v1003_v38 }
 0x103   : > { %v745_v44 = vadd.f32 %v2207_v46, %v744_v43  ;;  %v951_v45 = vmax.f32 %v753_v41, 0.0 }
 0x104   : > { %v1864_v47 = vpop.f32.mrf.mxu0 }
 0x105   : > { %v949_v49 = vmax.f32 %v745_v44, 0.0  ;;  %v1005_v53 = vpack.c.bf16 %v951_v45, %v950_v50  ;;  %v766_v57 = vadd.f32 %v1864_v47, %v2207_v46 }
 0x106   : > { %v757_v51 = vpop.f32.mrf.mxu0 }
 0x107   : > { %v1004_v52 = vpack.c.bf16 %v949_v49, %v948_v48  ;;  %v758_v55 = vadd.f32 %v2207_v46, %v757_v51  ;;  %v954_v0 = vmax.f32 %v766_v57, 0.0 }
 0x108   : > { %v1865_v54 = vpop.f32.mrf.mxu0 }
 0x109   : > { %v769_v56 = vadd.f32 %v1865_v54, %v2207_v46  ;;  %1938 = vmatprep.mubr.bf16.mxu1 %v1004_v52  ;;  %v952_v62 = vmax.f32 %v758_v55, 0.0 }
 0x10a   : > { %v760_v58 = vpop.f32.mrf.mxu0  ;;  %1939 = vmatmul.mubr.bf16.gmra.mxu1 %v1005_v53 }
 0x10b   : > { %v761_v59 = vadd.f32 %v2207_v46, %v760_v58  ;;  %v955_v60 = vmax.f32 %v769_v56, 0.0 }
 0x10c   : > { %v1868_v61 = vpop.f32.mrf.mxu0 }
 0x10d   : > { %v953_v63 = vmax.f32 %v761_v59, 0.0  ;;  %v1007_v3 = vpack.c.bf16 %v955_v60, %v954_v0  ;;  %v782_v7 = vadd.f32 %v1868_v61, %v2207_v46 }
 0x10e   : > { %v773_v1 = vpop.f32.mrf.mxu0 }
 0x10f   : > { %v1006_v2 = vpack.c.bf16 %v953_v63, %v952_v62  ;;  %v774_v5 = vadd.f32 %v2207_v46, %v773_v1  ;;  %v958_v14 = vmax.f32 %v782_v7, 0.0 }
 0x110   : > { %v1869_v4 = vpop.f32.mrf.mxu0 }
 0x111   : > { %v785_v6 = vadd.f32 %v1869_v4, %v2207_v46  ;;  %1942 = vmatprep.mubr.bf16.mxu1 %v1006_v2  ;;  %v956_v12 = vmax.f32 %v774_v5, 0.0 }
 0x112   : > { %v776_v8 = vpop.f32.mrf.mxu0  ;;  %1943 = vmatmul.mubr.bf16.gmra.mxu1 %v1007_v3 }
 0x113   : > { %v777_v9 = vadd.f32 %v2207_v46, %v776_v8  ;;  %v959_v10 = vmax.f32 %v785_v6, 0.0 }
 0x114   : > { %v1872_v11 = vpop.f32.mrf.mxu0 }
 0x115   : > { %v957_v13 = vmax.f32 %v777_v9, 0.0  ;;  %v1009_v17 = vpack.c.bf16 %v959_v10, %v958_v14  ;;  %v798_v21 = vadd.f32 %v1872_v11, %v2207_v46 }
 0x116   : > { %v789_v15 = vpop.f32.mrf.mxu0 }
 0x117   : > { %v1008_v16 = vpack.c.bf16 %v957_v13, %v956_v12  ;;  %v790_v19 = vadd.f32 %v2207_v46, %v789_v15  ;;  %v962_v28 = vmax.f32 %v798_v21, 0.0 }
 0x118   : > { %v1873_v18 = vpop.f32.mrf.mxu0 }
 0x119   : > { %v801_v20 = vadd.f32 %v1873_v18, %v2207_v46  ;;  %1946 = vmatprep.mubr.bf16.mxu1 %v1008_v16  ;;  %v960_v26 = vmax.f32 %v790_v19, 0.0 }
 0x11a   : > { %v792_v22 = vpop.f32.mrf.mxu0  ;;  %1947 = vmatmul.mubr.bf16.gmra.mxu1 %v1009_v17 }
 0x11b   : > { %v793_v23 = vadd.f32 %v2207_v46, %v792_v22  ;;  %v963_v24 = vmax.f32 %v801_v20, 0.0 }
 0x11c   : > { %v1876_v25 = vpop.f32.mrf.mxu0 }
 0x11d   : > { %v961_v27 = vmax.f32 %v793_v23, 0.0  ;;  %v1011_v31 = vpack.c.bf16 %v963_v24, %v962_v28  ;;  %v814_v35 = vadd.f32 %v1876_v25, %v2207_v46 }
 0x11e   : > { %v805_v29 = vpop.f32.mrf.mxu0 }
 0x11f   : > { %v1010_v30 = vpack.c.bf16 %v961_v27, %v960_v26  ;;  %v806_v33 = vadd.f32 %v2207_v46, %v805_v29  ;;  %v966_v42 = vmax.f32 %v814_v35, 0.0 }
 0x120   : > { %v1877_v32 = vpop.f32.mrf.mxu0 }
 0x121   : > { %v817_v34 = vadd.f32 %v1877_v32, %v2207_v46  ;;  %1950 = vmatprep.mubr.bf16.mxu1 %v1010_v30  ;;  %v964_v40 = vmax.f32 %v806_v33, 0.0 }
 0x122   : > { %v808_v36 = vpop.f32.mrf.mxu0  ;;  %1951 = vmatmul.mubr.bf16.gmra.mxu1 %v1011_v31 }
 0x123   : > { %v809_v37 = vadd.f32 %v2207_v46, %v808_v36  ;;  %v967_v38 = vmax.f32 %v817_v34, 0.0 }
 0x124   : > { %v1880_v39 = vpop.f32.mrf.mxu0 }
 0x125   : > { %v965_v41 = vmax.f32 %v809_v37, 0.0  ;;  %v1013_v45 = vpack.c.bf16 %v967_v38, %v966_v42  ;;  %v830_v50 = vadd.f32 %v1880_v39, %v2207_v46 }
 0x126   : > { %v821_v43 = vpop.f32.mrf.mxu0 }
 0x127   : > { %v1012_v44 = vpack.c.bf16 %v965_v41, %v964_v40  ;;  %v822_v48 = vadd.f32 %v2207_v46, %v821_v43  ;;  %v970_v57 = vmax.f32 %v830_v50, 0.0 }
 0x128   : > { %v1881_v47 = vpop.f32.mrf.mxu0 }
 0x129   : > { %v833_v49 = vadd.f32 %v1881_v47, %v2207_v46  ;;  %1954 = vmatprep.mubr.bf16.mxu1 %v1012_v44  ;;  %v968_v55 = vmax.f32 %v822_v48, 0.0 }
 0x12a   : > { %v824_v51 = vpop.f32.mrf.mxu0  ;;  %1955 = vmatmul.mubr.bf16.gmra.mxu1 %v1013_v45 }
 0x12b   : > { %v825_v52 = vadd.f32 %v2207_v46, %v824_v51  ;;  %v971_v53 = vmax.f32 %v833_v49, 0.0 }
 0x12c   : > { %v1884_v54 = vpop.f32.mrf.mxu0 }
 0x12d   : > { %v969_v56 = vmax.f32 %v825_v52, 0.0  ;;  %v1015_v60 = vpack.c.bf16 %v971_v53, %v970_v57  ;;  %v846_v0 = vadd.f32 %v1884_v54, %v2207_v46 }
 0x12e   : > { %v837_v58 = vpop.f32.mrf.mxu0 }
 0x12f   : > { %v1014_v59 = vpack.c.bf16 %v969_v56, %v968_v55  ;;  %v838_v62 = vadd.f32 %v2207_v46, %v837_v58  ;;  %v974_v7 = vmax.f32 %v846_v0, 0.0 }
 0x130   : > { %v1885_v61 = vpop.f32.mrf.mxu0 }
 0x131   : > { %v849_v63 = vadd.f32 %v1885_v61, %v2207_v46  ;;  %1958 = vmatprep.mubr.bf16.mxu1 %v1014_v59  ;;  %v972_v5 = vmax.f32 %v838_v62, 0.0 }
 0x132   : > { %v840_v1 = vpop.f32.mrf.mxu0  ;;  %1959 = vmatmul.mubr.bf16.gmra.mxu1 %v1015_v60 }
 0x133   : > { %v841_v2 = vadd.f32 %v2207_v46, %v840_v1  ;;  %v975_v3 = vmax.f32 %v849_v63, 0.0 }
 0x134   : > { %v1888_v4 = vpop.f32.mrf.mxu0 }
 0x135   : > { %v973_v6 = vmax.f32 %v841_v2, 0.0  ;;  %v1017_v10 = vpack.c.bf16 %v975_v3, %v974_v7  ;;  %v862_v14 = vadd.f32 %v1888_v4, %v2207_v46 }
 0x136   : > { %v853_v8 = vpop.f32.mrf.mxu0 }
 0x137   : > { %v1016_v9 = vpack.c.bf16 %v973_v6, %v972_v5  ;;  %v854_v12 = vadd.f32 %v2207_v46, %v853_v8  ;;  %v978_v21 = vmax.f32 %v862_v14, 0.0 }
 0x138   : > { %v1889_v11 = vpop.f32.mrf.mxu0 }
 0x139   : > { %v865_v13 = vadd.f32 %v1889_v11, %v2207_v46  ;;  %1962 = vmatprep.mubr.bf16.mxu1 %v1016_v9  ;;  %v976_v19 = vmax.f32 %v854_v12, 0.0 }
 0x13a   : > { %v856_v15 = vpop.f32.mrf.mxu0  ;;  %1963 = vmatmul.mubr.bf16.gmra.mxu1 %v1017_v10 }
 0x13b   : > { %v857_v16 = vadd.f32 %v2207_v46, %v856_v15  ;;  %v979_v17 = vmax.f32 %v865_v13, 0.0 }
 0x13c   : > { %v1892_v18 = vpop.f32.mrf.mxu0 }
 0x13d   : > { %v977_v20 = vmax.f32 %v857_v16, 0.0  ;;  %v1019_v24 = vpack.c.bf16 %v979_v17, %v978_v21  ;;  %v878_v28 = vadd.f32 %v1892_v18, %v2207_v46  ;;  %v2276_v17 = vld [vmem:[%s2453_s4] ss:$0 sm:$0xff] }
 0x13e   : > { %v869_v22 = vpop.f32.mrf.mxu0 }
 0x13f   : > { %v1018_v23 = vpack.c.bf16 %v977_v20, %v976_v19  ;;  %v870_v26 = vadd.f32 %v2207_v46, %v869_v22  ;;  %v982_v35 = vmax.f32 %v878_v28, 0.0 }
 0x140   : > { %v1893_v25 = vpop.f32.mrf.mxu0 }
 0x141   : > { %v881_v27 = vadd.f32 %v1893_v25, %v2207_v46  ;;  %1966 = vmatprep.mubr.bf16.mxu1 %v1018_v23  ;;  %v980_v33 = vmax.f32 %v870_v26, 0.0 }
 0x142   : > { %v872_v29 = vpop.f32.mrf.mxu0  ;;  %1967 = vmatmul.mubr.bf16.gmra.mxu1 %v1019_v24 }
 0x143   : > { %v873_v30 = vadd.f32 %v2207_v46, %v872_v29  ;;  %v983_v31 = vmax.f32 %v881_v27, 0.0 }
 0x144   : > { %v1896_v32 = vpop.f32.mrf.mxu0 }
 0x145   : > { %v981_v34 = vmax.f32 %v873_v30, 0.0  ;;  %v1021_v38 = vpack.c.bf16 %v983_v31, %v982_v35  ;;  %v894_v42 = vadd.f32 %v1896_v32, %v2207_v46 }
 0x146   : > { %v885_v36 = vpop.f32.mrf.mxu0 }
 0x147   : > { %v1020_v37 = vpack.c.bf16 %v981_v34, %v980_v33  ;;  %v886_v40 = vadd.f32 %v2207_v46, %v885_v36  ;;  %v986_v50 = vmax.f32 %v894_v42, 0.0 }
 0x148   : > { %v1897_v39 = vpop.f32.mrf.mxu0 }
 0x149   : > { %v897_v41 = vadd.f32 %v1897_v39, %v2207_v46  ;;  %1970 = vmatprep.mubr.bf16.mxu1 %v1020_v37  ;;  %v984_v48 = vmax.f32 %v886_v40, 0.0 }
 0x14a   : > { %v888_v43 = vpop.f32.mrf.mxu0  ;;  %1971 = vmatmul.mubr.bf16.gmra.mxu1 %v1021_v38 }
 0x14b   : > { %v889_v44 = vadd.f32 %v2207_v46, %v888_v43  ;;  %v987_v45 = vmax.f32 %v897_v41, 0.0 }
 0x14c   : > { %v1900_v47 = vpop.f32.mrf.mxu0 }
 0x14d   : > { %v985_v49 = vmax.f32 %v889_v44, 0.0  ;;  %v1023_v53 = vpack.c.bf16 %v987_v45, %v986_v50  ;;  %v910_v57 = vadd.f32 %v1900_v47, %v2207_v46 }
 0x14e   : > { %v901_v51 = vpop.f32.mrf.mxu0 }
 0x14f   : > { %v1022_v52 = vpack.c.bf16 %v985_v49, %v984_v48  ;;  %v902_v55 = vadd.f32 %v2207_v46, %v901_v51  ;;  %v990_v0 = vmax.f32 %v910_v57, 0.0 }
 0x150   : > { %v1901_v54 = vpop.f32.mrf.mxu0 }
 0x151   : > { %v913_v56 = vadd.f32 %v1901_v54, %v2207_v46  ;;  %1974 = vmatprep.mubr.bf16.mxu1 %v1022_v52  ;;  %v988_v62 = vmax.f32 %v902_v55, 0.0 }
 0x152   : > { %v904_v58 = vpop.f32.mrf.mxu0  ;;  %1975 = vmatmul.mubr.bf16.gmra.mxu1 %v1023_v53 }
 0x153   : > { %v905_v59 = vadd.f32 %v2207_v46, %v904_v58  ;;  %v991_v60 = vmax.f32 %v913_v56, 0.0 }
 0x154   : > { %v1904_v61 = vpop.f32.mrf.mxu0 }
 0x155   : > { %v989_v63 = vmax.f32 %v905_v59, 0.0  ;;  %v1025_v3 = vpack.c.bf16 %v991_v60, %v990_v0  ;;  %v926_v7 = vadd.f32 %v1904_v61, %v2207_v46 }
 0x156   : > { %v917_v1 = vpop.f32.mrf.mxu0 }
 0x157   : > { %v1024_v2 = vpack.c.bf16 %v989_v63, %v988_v62  ;;  %v918_v5 = vadd.f32 %v2207_v46, %v917_v1  ;;  %v994_v13 = vmax.f32 %v926_v7, 0.0 }
 0x158   : > { %v1905_v4 = vpop.f32.mrf.mxu0 }
 0x159   : > { %v929_v6 = vadd.f32 %v1905_v4, %v2207_v46  ;;  %1978 = vmatprep.mubr.bf16.mxu1 %v1024_v2  ;;  %v992_v11 = vmax.f32 %v918_v5, 0.0 }
 0x15a   : > { %v920_v8 = vpop.f32.mrf.mxu0  ;;  %1979 = vmatmul.mubr.bf16.gmra.mxu1 %v1025_v3 }
 0x15b   : > { %v921_v9 = vadd.f32 %v2207_v46, %v920_v8  ;;  %v995_v10 = vmax.f32 %v929_v6, 0.0 }
 0x15d   : > { %v993_v12 = vmax.f32 %v921_v9, 0.0  ;;  %v1027_v15 = vpack.c.bf16 %v995_v10, %v994_v13 }
 0x15f   : > { %v1026_v14 = vpack.c.bf16 %v993_v12, %v992_v11 }
 0x161   : > { %1982 = vmatprep.mubr.bf16.mxu1 %v1026_v14  ;;  %v2324_v14 = vld [vmem:[%s2454_s5] sm:$0xf] }
 0x162   : > { %1983 = vmatmul.mubr.bf16.gmra.mxu1 %v1027_v15  ;;  %1814 = vmatprep.mubr.bf16.mxu0 %v2324_v14 }
 0x163   : > { %1832 = vmatprep.mubr.bf16.mxu1 %v2324_v14 }
 0x1aa   : > { %v1924_v16 = vpop.f32.mrf.mxu1 }
 0x1ab   : > { %v1142_v19 = vadd.f32 %v1924_v16, %v2276_v17 }
 0x1ac   : > { %v1133_v18 = vpop.f32.mrf.mxu1 }
 0x1ad   : > { %v1134_v46 = vadd.f32 %v2276_v17, %v1133_v18  ;;  %v1390_v23 = vmax.f32 %v1142_v19, 0.0 }
 0x1ae   : > { %v1925_v20 = vpop.f32.mrf.mxu1 }
 0x1af   : > { %v1145_v21 = vadd.f32 %v1925_v20, %v2276_v17  ;;  %v1388_v27 = vmax.f32 %v1134_v46, 0.0 }
 0x1b0   : > { %v1136_v22 = vpop.f32.mrf.mxu1 }
 0x1b1   : > { %v1391_v24 = vmax.f32 %v1145_v21, 0.0  ;;  %v1137_v25 = vadd.f32 %v2276_v17, %v1136_v22 }
 0x1b2   : > { %v1928_v26 = vpop.f32.mrf.mxu1 }
 0x1b3   : > { %v2282_v28 = vpack.c.bf16 %v1391_v24, %v1390_v23  ;;  %v1389_v29 = vmax.f32 %v1137_v25, 0.0  ;;  %v1158_v32 = vadd.f32 %v1928_v26, %v2276_v17 }
 0x1b4   : > { %v1149_v30 = vpop.f32.mrf.mxu1 }
 0x1b5   : > { %v2284_v31 = vpack.c.bf16 %v1389_v29, %v1388_v27  ;;  %v1150_v34 = vadd.f32 %v2276_v17, %v1149_v30  ;;  %v1394_v37 = vmax.f32 %v1158_v32, 0.0 }
 0x1b6   : > { %v1929_v33 = vpop.f32.mrf.mxu1 }
 0x1b7   : > { %v1161_v35 = vadd.f32 %v1929_v33, %v2276_v17  ;;  %v1392_v41 = vmax.f32 %v1150_v34, 0.0 }
 0x1b8   : > { %v1152_v36 = vpop.f32.mrf.mxu1 }
 0x1b9   : > { %v1395_v38 = vmax.f32 %v1161_v35, 0.0  ;;  %v1153_v39 = vadd.f32 %v2276_v17, %v1152_v36 }
 0x1ba   : > { %v2290_v40 = vpop.f32.mrf.mxu1 }
 0x1bb   : > { %v2292_v42 = vpack.c.bf16 %v1395_v38, %v1394_v37  ;;  %v1393_v43 = vmax.f32 %v1153_v39, 0.0  ;;  %v1485_v38 = vld [vmem:[%s2455_s6] sm:$0xff] }
 0x1bc   : > { %v2294_v44 = vpop.f32.mrf.mxu1 }
 0x1bd   : > { %v2296_v45 = vpack.c.bf16 %v1393_v43, %v1392_v41  ;;  %v2048_v43 = vmov 0  }
 0x1be   : > { %v2298_v47 = vpop.f32.mrf.mxu1  ;;  %1995 = vset.pattern.permute.xlu0 %v2048_v43 }
 0x1bf   : > { %1488 = vperm.xlu0 %1995, %v1485_v38  }
 0x1c0   : > { %v2300_v48 = vpop.f32.mrf.mxu1 }
 0x1c2   : > { %v1936_v49 = vpop.f32.mrf.mxu1 }
 0x1c3   : > { %v1190_v16 = vadd.f32 %v1936_v49, %v2276_v17 }
 0x1c4   : > { %v1181_v50 = vpop.f32.mrf.mxu1 }
 0x1c5   : > { %v1402_v25 = vmax.f32 %v1190_v16, 0.0  ;;  %v1182_v39 = vadd.f32 %v2276_v17, %v1181_v50  ;;  %v1174_v16 = vadd.f32 %v2290_v40, %v2276_v17 }
 0x1c6   : > { %v1937_v51 = vpop.f32.mrf.mxu1 }
 0x1c7   : > { %v1193_v12 = vadd.f32 %v1937_v51, %v2276_v17  ;;  %v1400_v50 = vmax.f32 %v1182_v39, 0.0 }
 0x1c8   : > { %v1184_v52 = vpop.f32.mrf.mxu1 }
 0x1c9   : > { %v1403_v46 = vmax.f32 %v1193_v12, 0.0  ;;  %v1185_v33 = vadd.f32 %v2276_v17, %v1184_v52 }
 0x1ca   : > { %v1940_v53 = vpop.f32.mrf.mxu1 }
 0x1cb   : > { %v1206_v55 = vadd.f32 %v1940_v53, %v2276_v17  ;;  %v1460_v32 = vpack.c.bf16 %v1403_v46, %v1402_v25  ;;  %v1401_v53 = vmax.f32 %v1185_v33, 0.0  ;;  %v1398_v25 = vmax.f32 %v1174_v16, 0.0 }
 0x1cc   : > { %v1197_v54 = vpop.f32.mrf.mxu1 }
 0x1cd   : > { %v1198_v57 = vadd.f32 %v2276_v17, %v1197_v54  ;;  %v1406_v60 = vmax.f32 %v1206_v55, 0.0 }
 0x1ce   : > { %v1941_v56 = vpop.f32.mrf.mxu1 }
 0x1cf   : > { %v1209_v58 = vadd.f32 %v1941_v56, %v2276_v17  ;;  %v1404_v0 = vmax.f32 %v1198_v57, 0.0 }
 0x1d0   : > { %v1200_v59 = vpop.f32.mrf.mxu1 }
 0x1d1   : > { %v1407_v61 = vmax.f32 %v1209_v58, 0.0  ;;  %v1201_v62 = vadd.f32 %v2276_v17, %v1200_v59 }
 0x1d2   : > { %v2306_v63 = vpop.f32.mrf.mxu1 }
 0x1d3   : > { %v2308_v1 = vpack.c.bf16 %v1407_v61, %v1406_v60  ;;  %v1405_v2 = vmax.f32 %v1201_v62, 0.0  ;;  %v1222_v39 = vadd.f32 %v2306_v63, %v2276_v17 }
 0x1d4   : > { %v2310_v3 = vpop.f32.mrf.mxu1 }
 0x1d5   : > { %v2312_v4 = vpack.c.bf16 %v1405_v2, %v1404_v0  ;;  %v1177_v2 = vadd.f32 %v2298_v47, %v2276_v17  ;;  %v1214_v63 = vadd.f32 %v2276_v17, %v2310_v3 }
 0x1d6   : > { %v2314_v5 = vpop.f32.mrf.mxu1 }
 0x1d7   : > { %v1399_v46 = vmax.f32 %v1177_v2, 0.0 }
 0x1d8   : > { %v2316_v6 = vpop.f32.mrf.mxu1 }
 0x1da   : > { %v1948_v7 = vpop.f32.mrf.mxu1 }
 0x1db   : > { %v1238_v49 = vadd.f32 %v1948_v7, %v2276_v17  ;;  %v1459_v7 = vpack.c.bf16 %v1401_v53, %v1400_v50  ;;  %v1408_v50 = vmax.f32 %v1214_v63, 0.0 }
 0x1dc   : > { %v2318_v8 = vpop.f32.mrf.mxu1 }
 0x1dd   : > { %v1414_v60 = vmax.f32 %v1238_v49, 0.0 }
 0x1de   : > { %v1949_v9 = vpop.f32.mrf.mxu1 }
 0x1df   : > { %v1241_v35 = vadd.f32 %v1949_v9, %v2276_v17 }
 0x1e0   : > { %v1232_v10 = vpop.f32.mrf.mxu1 }
 0x1e1   : > { %v1415_v55 = vmax.f32 %v1241_v35, 0.0  ;;  %v1233_v12 = vadd.f32 %v2276_v17, %v1232_v10 }
 0x1e2   : > { %v1952_v11 = vpop.f32.mrf.mxu1 }
 0x1e3   : > { %v1254_v15 = vadd.f32 %v1952_v11, %v2276_v17  ;;  %v1466_v11 = vpack.c.bf16 %v1415_v55, %v1414_v60  ;;  %v1413_v10 = vmax.f32 %v1233_v12, 0.0 }
 0x1e4   : > { %v1245_v13 = vpop.f32.mrf.mxu1 }
 0x1e5   : > { %v1246_v19 = vadd.f32 %v2276_v17, %v1245_v13  ;;  %v1418_v22 = vmax.f32 %v1254_v15, 0.0 }
 0x1e6   : > { %v1953_v18 = vpop.f32.mrf.mxu1 }
 0x1e7   : > { %v1257_v20 = vadd.f32 %v1953_v18, %v2276_v17  ;;  %v1416_v27 = vmax.f32 %v1246_v19, 0.0  ;;  %v1230_v19 = vadd.f32 %v2276_v17, %v2318_v8 }
 0x1e8   : > { %v1248_v21 = vpop.f32.mrf.mxu1 }
 0x1e9   : > { %v1419_v23 = vmax.f32 %v1257_v20, 0.0  ;;  %v1249_v24 = vadd.f32 %v2276_v17, %v1248_v21  ;;  %v1412_v40 = vmax.f32 %v1230_v19, 0.0 }
 0x1ea   : > { %v1956_v26 = vpop.f32.mrf.mxu1 }
 0x1eb   : > { %v1468_v29 = vpack.c.bf16 %v1419_v23, %v1418_v22  ;;  %v1417_v30 = vmax.f32 %v1249_v24, 0.0  ;;  %v1270_v37 = vadd.f32 %v1956_v26, %v2276_v17  ;;  %v1465_v35 = vpack.c.bf16 %v1413_v10, %v1412_v40 }
 0x1ec   : > { %v1261_v34 = vpop.f32.mrf.mxu1 }
 0x1ed   : > { %v1467_v36 = vpack.c.bf16 %v1417_v30, %v1416_v27  ;;  %1798 = vmatprep.subr.bf16.mxu0 %v1468_v29  ;;  %v1262_v51 = vadd.f32 %v2276_v17, %v1261_v34  ;;  %v1422_v56 = vmax.f32 %v1270_v37, 0.0  ;;  %v1458_v30 = vpack.c.bf16 %v1399_v46, %v1398_v25 }
 0x1ee   : > { %v1957_v41 = vpop.f32.mrf.mxu1  ;;  %1799 = vmatpush3.bf16.xpose.msra.mxu0 %v1460_v32  ;;  %v1169_v32 = vadd.f32 %v2276_v17, %v2300_v48  ;;  %v1225_v34 = vadd.f32 %v2314_v5, %v2276_v17  ;;  %v1166_v37 = vadd.f32 %v2276_v17, %v2294_v44  ;;  %v1410_v5 = vmax.f32 %v1222_v39, 0.0 }
 0x1ef   : > { %v1273_v52 = vadd.f32 %v1957_v41, %v2276_v17  ;;  %1800 = vmatprep.subr.bf16.mxu0 %v1467_v36  ;;  %v1420_v61 = vmax.f32 %v1262_v51, 0.0  ;;  %v1217_v44 = vadd.f32 %v2276_v17, %v2316_v6 }
 0x1f0   : > { %v1264_v54 = vpop.f32.mrf.mxu1  ;;  %v1397_v41 = vmax.f32 %v1169_v32, 0.0  ;;  %v1411_v43 = vmax.f32 %v1225_v34, 0.0  ;;  %v1396_v49 = vmax.f32 %v1166_v37, 0.0 }
 0x1f1   : > { %v1423_v57 = vmax.f32 %v1273_v52, 0.0  ;;  %v1265_v58 = vadd.f32 %v2276_v17, %v1264_v54 }
 0x1f2   : > { %v1960_v59 = vpop.f32.mrf.mxu1  ;;  %v1457_v52 = vpack.c.bf16 %v1397_v41, %v1396_v49  ;;  %v1464_v54 = vpack.c.bf16 %v1411_v43, %v1410_v5 }
 0x1f3   : > { %v2344_v62 = vpack.c.bf16 %v1423_v57, %v1422_v56  ;;  %v1421_v0 = vmax.f32 %v1265_v58, 0.0  ;;  %v1286_v15 = vadd.f32 %v1960_v59, %v2276_v17  ;;  %v1409_v57 = vmax.f32 %v1217_v44, 0.0 }
 0x1f4   : > { %v1277_v9 = vpop.f32.mrf.mxu1 }
 0x1f5   : > { %v2349_v13 = vpack.c.bf16 %v1421_v0, %v1420_v61  ;;  %v1278_v20 = vadd.f32 %v2276_v17, %v1277_v9  ;;  %v1426_v22 = vmax.f32 %v1286_v15, 0.0  ;;  %v1463_v60 = vpack.c.bf16 %v1409_v57, %v1408_v50 }
 0x1f6   : > { %v1961_v18 = vpop.f32.mrf.mxu1  ;;  %1801 = vmatpush3.bf16.xpose.msra.mxu0 %v1459_v7 }
 0x1f7   : > { %v1289_v47 = vadd.f32 %v1961_v18, %v2276_v17  ;;  %1802 = vmatprep.subr.bf16.mxu0 %v1466_v11  ;;  %v1424_v27 = vmax.f32 %v1278_v20, 0.0 }
 0x1f8   : > { %v1280_v21 = vpop.f32.mrf.mxu1 }
 0x1f9   : > { %v1427_v23 = vmax.f32 %v1289_v47, 0.0  ;;  %v1281_v24 = vadd.f32 %v2276_v17, %v1280_v21 }
 0x1fa   : > { %v2359_v26 = vpop.f32.mrf.mxu1 }
 0x1fb   : > { %v2361_v29 = vpack.c.bf16 %v1427_v23, %v1426_v22  ;;  %v1425_v8 = vmax.f32 %v1281_v24, 0.0 }
 0x1fc   : > { %v2365_v33 = vpop.f32.mrf.mxu1 }
 0x1fd   : > { %v2369_v36 = vpack.c.bf16 %v1425_v8, %v1424_v27 }
 0x1fe   : > { %v2373_v38 = vpop.f32.mrf.mxu1  ;;  %1803 = vmatpush3.bf16.xpose.msra.mxu0 %v1458_v30 }
 0x1ff   : > { %1804 = vmatprep.subr.bf16.mxu0 %v1465_v35 }
 0x200   : > { %v2377_v48 = vpop.f32.mrf.mxu1 }
 0x202   : > { %v1968_v51 = vpop.f32.mrf.mxu1 }
 0x204   : > { %v2379_v53 = vpop.f32.mrf.mxu1 }
 0x205   : > { %v1310_v5 = vadd.f32 %v2276_v17, %v2379_v53 }
 0x206   : > { %v1969_v55 = vpop.f32.mrf.mxu1  ;;  %1805 = vmatpush3.bf16.xpose.msra.mxu0 %v1457_v52 }
 0x207   : > { %1806 = vmatprep.subr.bf16.mxu0 %v1464_v54  ;;  %v1321_v24 = vadd.f32 %v1969_v55, %v2276_v17  ;;  %v1432_v55 = vmax.f32 %v1310_v5, 0.0 }
 0x208   : > { %v1312_v56 = vpop.f32.mrf.mxu1 }
 0x209   : > { %v1435_v30 = vmax.f32 %v1321_v24, 0.0  ;;  %v1313_v49 = vadd.f32 %v2276_v17, %v1312_v56  ;;  %v1305_v56 = vadd.f32 %v2373_v38, %v2276_v17 }
 0x20a   : > { %v1972_v58 = vpop.f32.mrf.mxu1 }
 0x20b   : > { %v1334_v61 = vadd.f32 %v1972_v58, %v2276_v17  ;;  %v1433_v54 = vmax.f32 %v1313_v49, 0.0 }
 0x20c   : > { %v1325_v59 = vpop.f32.mrf.mxu1 }
 0x20d   : > { %v1326_v2 = vadd.f32 %v2276_v17, %v1325_v59  ;;  %v1438_v9 = vmax.f32 %v1334_v61, 0.0  ;;  %v1475_v57 = vpack.c.bf16 %v1433_v54, %v1432_v55  ;;  %v1302_v59 = vadd.f32 %v2359_v26, %v2276_v17 }
 0x20e   : > { %v1973_v0 = vpop.f32.mrf.mxu1  ;;  %1807 = vmatpush3.bf16.xpose.msra.mxu0 %v2292_v42 }
 0x20f   : > { %v1337_v6 = vadd.f32 %v1973_v0, %v2276_v17  ;;  %1808 = vmatprep.subr.bf16.mxu0 %v1463_v60  ;;  %v1436_v15 = vmax.f32 %v1326_v2, 0.0  ;;  %v1431_v60 = vmax.f32 %v1305_v56, 0.0  ;;  %v1430_v0 = vmax.f32 %v1302_v59, 0.0 }
 0x210   : > { %v1328_v7 = vpop.f32.mrf.mxu1 }
 0x211   : > { %v1439_v3 = vmax.f32 %v1337_v6, 0.0  ;;  %v1329_v11 = vadd.f32 %v2276_v17, %v1328_v7  ;;  %v1474_v6 = vpack.c.bf16 %v1431_v60, %v1430_v0  ;;  %v1297_v7 = vadd.f32 %v2276_v17, %v2377_v48 }
 0x212   : > { %v2390_v12 = vpop.f32.mrf.mxu1 }
 0x213   : > { %v2392_v16 = vpack.c.bf16 %v1439_v3, %v1438_v9  ;;  %v1437_v18 = vmax.f32 %v1329_v11, 0.0  ;;  %v1294_v3 = vadd.f32 %v2276_v17, %v2365_v33  ;;  %v1350_v26 = vadd.f32 %v2390_v12, %v2276_v17 }
 0x214   : > { %v2394_v19 = vpop.f32.mrf.mxu1  ;;  %v1429_v11 = vmax.f32 %v1297_v7, 0.0 }
 0x215   : > { %v2396_v20 = vpack.c.bf16 %v1437_v18, %v1436_v15  ;;  %v1428_v18 = vmax.f32 %v1294_v3, 0.0 }
 0x216   : > { %v1977_v42 = vpop.f32.mrf.mxu1  ;;  %1809 = vmatpush3.bf16.xpose.msra.mxu0 %v2296_v45  ;;  %v1318_v45 = vadd.f32 %v1968_v51, %v2276_v17 }
 0x217   : > { %1810 = vmatprep.subr.bf16.mxu0 %v2308_v1  ;;  %v1353_v38 = vadd.f32 %v1977_v42, %v2276_v17  ;;  %v1342_v42 = vadd.f32 %v2276_v17, %v2394_v19 }
 0x218   : > { %v2400_v47 = vpop.f32.mrf.mxu1  ;;  %v1434_v35 = vmax.f32 %v1318_v45, 0.0 }
 0x219   : > { %v1443_v15 = vmax.f32 %v1353_v38, 0.0  ;;  %v1345_v48 = vadd.f32 %v2276_v17, %v2400_v47 }
 0x21a   : > { %v1980_v46 = vpop.f32.mrf.mxu1  ;;  %v1476_v43 = vpack.c.bf16 %v1435_v30, %v1434_v35 }
 0x21b   : > { %v1366_v52 = vadd.f32 %v1980_v46, %v2276_v17  ;;  %v1442_v46 = vmax.f32 %v1350_v26, 0.0  ;;  %v1441_v33 = vmax.f32 %v1345_v48, 0.0 }
 0x21c   : > { %v1357_v21 = vpop.f32.mrf.mxu1 }
 0x21d   : > { %v1446_v63 = vmax.f32 %v1366_v52, 0.0  ;;  %v1358_v53 = vadd.f32 %v2276_v17, %v1357_v21  ;;  %v1473_v21 = vpack.c.bf16 %v1429_v11, %v1428_v18 }
 0x21e   : > { %v1981_v10 = vpop.f32.mrf.mxu1  ;;  %1811 = vmatpush3.bf16.xpose.msra.mxu0 %v2282_v28 }
 0x21f   : > { %1812 = vmatprep.subr.bf16.mxu0 %v2312_v4  ;;  %v1369_v51 = vadd.f32 %v1981_v10, %v2276_v17  ;;  %v1444_v2 = vmax.f32 %v1358_v53, 0.0  ;;  %v1480_v10 = vpack.c.bf16 %v1443_v15, %v1442_v46 }
 0x220   : > { %v1360_v22 = vpop.f32.mrf.mxu1 }
 0x221   : > { %v1447_v44 = vmax.f32 %v1369_v51, 0.0  ;;  %v1361_v50 = vadd.f32 %v2276_v17, %v1360_v22  ;;  %v1440_v22 = vmax.f32 %v1342_v42, 0.0 }
 0x222   : > { %v1984_v23 = vpop.f32.mrf.mxu1 }
 0x223   : > { %v1382_v40 = vadd.f32 %v1984_v23, %v2276_v17  ;;  %v1482_v58 = vpack.c.bf16 %v1447_v44, %v1446_v63  ;;  %v1445_v61 = vmax.f32 %v1361_v50, 0.0  ;;  %v1479_v23 = vpack.c.bf16 %v1441_v33, %v1440_v22 }
 0x224   : > { %v1373_v25 = vpop.f32.mrf.mxu1 }
 0x225   : > { %v1374_v1 = vadd.f32 %v2276_v17, %v1373_v25  ;;  %v1450_v32 = vmax.f32 %v1382_v40, 0.0  ;;  %v1481_v9 = vpack.c.bf16 %v1445_v61, %v1444_v2 }
 0x226   : > { %v1985_v27 = vpop.f32.mrf.mxu1  ;;  %1813 = vmatpush3.bf16.xpose.msra.mxu0 %v2284_v31 }
 0x227   : > { %v1385_v8 = vadd.f32 %v1985_v27, %v2276_v17  ;;  %v1448_v37 = vmax.f32 %v1374_v1, 0.0 }
 0x228   : > { %v1376_v28 = vpop.f32.mrf.mxu1 }
 0x229   : > { %v1451_v4 = vmax.f32 %v1385_v8, 0.0  ;;  %v1377_v34 = vadd.f32 %v2276_v17, %v1376_v28 }
 0x22b   : > { %v1484_v39 = vpack.c.bf16 %v1451_v4, %v1450_v32  ;;  %v1449_v41 = vmax.f32 %v1377_v34, 0.0 }
 0x22d   : > { %v1483_v31 = vpack.c.bf16 %v1449_v41, %v1448_v37  ;;  %1816 = vmatprep.subr.bf16.mxu1 %v1484_v39  ;;  %1815 = vmatmul.mubr.bf16.vlgmr.msra.gmra.mxu0 %v2324_v14 }
 0x22e   : > { %1817 = vmatpush3.bf16.xpose.msra.mxu1 %v1476_v43 }
 0x22f   : > { %1818 = vmatprep.subr.bf16.mxu1 %v1483_v31 }
 0x236   : > { %1819 = vmatpush3.bf16.xpose.msra.mxu1 %v1475_v57 }
 0x237   : > { %1820 = vmatprep.subr.bf16.mxu1 %v1482_v58 }
 0x23a   : > { %v1489_v17 = vpop.permute.xlu0 %1488 }
 0x23e   : > { %1821 = vmatpush3.bf16.xpose.msra.mxu1 %v1474_v6 }
 0x23f   : > { %1822 = vmatprep.subr.bf16.mxu1 %v1481_v9 }
 0x246   : > { %1823 = vmatpush3.bf16.xpose.msra.mxu1 %v1473_v21 }
 0x247   : > { %1824 = vmatprep.subr.bf16.mxu1 %v1480_v10 }
 0x24e   : > { %1825 = vmatpush3.bf16.xpose.msra.mxu1 %v2361_v29 }
 0x24f   : > { %1826 = vmatprep.subr.bf16.mxu1 %v1479_v23 }
 0x256   : > { %1827 = vmatpush3.bf16.xpose.msra.mxu1 %v2369_v36 }
 0x257   : > { %1828 = vmatprep.subr.bf16.mxu1 %v2392_v16 }
 0x25e   : > { %1829 = vmatpush3.bf16.xpose.msra.mxu1 %v2344_v62 }
 0x25f   : > { %1830 = vmatprep.subr.bf16.mxu1 %v2396_v20 }
 0x266   : > { %1831 = vmatpush3.bf16.xpose.msra.mxu1 %v2349_v13 }
 0x26d   : > { %1833 = vmatmul.mubr.bf16.vlgmr.msra.gmra.mxu1 %v2324_v14 }
 0x2ed   : > { %v1525_v29 = vpop.f32.mrf.mxu0 }
 0x2ee   : > { %v1526_v36 = vadd.f32 %v1525_v29, %v1489_v17 }
 0x2ef   : > { %v1527_v12 = vpop.f32.mrf.mxu0 }
 0x2f0   : > { %v1528_v62 = vadd.f32 %v1527_v12, %v1489_v17  ;;  %1573 = vst [vmem:[%s280_s23] sm:$0xff] %v1526_v36 }
 0x2f1   : > { %v1529_v16 = vpop.f32.mrf.mxu0 }
 0x2f2   : > { %1574 = vst [vmem:[%s280_s23 + $0x8] sm:$0xff] %v1528_v62 }
 0x2f3   : > { %v1530_v13 = vpop.f32.mrf.mxu0 }
 0x32d   : > { %v1566_v19 = vpop.f32.mrf.mxu1 }
 0x32e   : > { %v1567_v14 = vadd.f32 %v1566_v19, %v1489_v17 }
 0x32f   : > { %v1568_v20 = vpop.f32.mrf.mxu1 }
 0x330   : > { %v1569_v47 = vadd.f32 %v1568_v20, %v1489_v17  ;;  %1575 = vst [vmem:[%s280_s23 + $0x10] sm:$0xff] %v1567_v14 }
 0x331   : > { %v1570_v24 = vpop.f32.mrf.mxu1 }
 0x332   : > { %1576 = vst [vmem:[%s280_s23 + $0x18] sm:$0xff] %v1569_v47 }
 0x333   : > { %v1571_v25 = vpop.f32.mrf.mxu1 }
 0x334 PF: > { %s17_s24 = sadd.s32 1, %s2046_s24  }
 0x335   : > { %p14_p5 = scmp.ge.s32.totalorder %s17_s24, 4  }
 0x337   :  { %16 = sbr.rel (!%p14_p5) target bundleno = 1 (0x1), region = 78 }

</bundles_post_ra>
